<compile_context>
chip_gen: v7x
topology: tpu7x:2x2x1
jax: 0.10.0
libtpu: 0.0.40
codegen_flags: <defaults>
</compile_context>

<pallas_src>
import functools

import jax
import jax.numpy as jnp
from jax.experimental import pallas as pl
from jax.experimental.pallas import tpu as pltpu

_LANE = 128


def _round_up(n: int, m: int) -> int:
    return ((n + m - 1) // m) * m


def _sublane(dtype) -> int:
    # Packed sublane rows: 8 for 4-byte, 16 for 2-byte, 32 for 1-byte dtypes.
    return max(8, 32 // jnp.dtype(dtype).itemsize)


# --------------------------------------------------------------------------- #
# Kernel
# --------------------------------------------------------------------------- #
def _mlp_kernel(n_layers, out_pads, *refs):
    """refs = (x_ref, w0, ..., w{L-1}, b_stack_ref, out_ref).

    x_ref:   (TB, in_pad)            activation tile (pipelined over batch grid)
    w_i:     (in_pad_i, out_pad_i)   VMEM-resident padded weight (MXU dtype)
    b_stack: (L, max_out_pad)        f32 biases, one row per layer
    out_ref: (TB, out_pad_last)
    """
    x_ref = refs[0]
    w_refs = refs[1:1 + n_layers]
    b_ref = refs[1 + n_layers]
    out_ref = refs[2 + n_layers]

    h = x_ref[...]
    # TODO(synk): for deep MLPs with uniform hidden width, replace this static
    # unroll with lax.fori_loop over a stacked (L, H, H) weight array.
    for i in range(n_layers):
        w = w_refs[i][...]
        # MXU matmul in the weights' dtype (bf16 by default), f32 accumulation.
        acc = jnp.dot(h.astype(w.dtype), w, preferred_element_type=jnp.float32)
        # Static row / lane-aligned slice of the stacked bias -> (1, out_pad_i).
        b = b_ref[i:i + 1, 0:out_pads[i]].astype(jnp.float32)
        acc = acc + b
        if i < n_layers - 1:
            h = jnp.maximum(acc, 0.0)            # ReLU in f32 (VPU)
        else:
            out_ref[...] = acc.astype(out_ref.dtype)


# --------------------------------------------------------------------------- #
# One-time parameter preparation (hoisted out of the per-call path)
# --------------------------------------------------------------------------- #
def prepare_growable_mlp(weights, biases, *, mxu_dtype="auto"):
    """Pad / cast parameters once; reuse the result for every forward call.

    weights[i]: (in_dim_i, out_dim_i)  (already transposed vs. PyTorch Linear)
    biases[i]:  (out_dim_i,)
    mxu_dtype:  "auto" -> bf16 operands when params are f32 (documented ~1e-2
                relative delta vs the f32 reference); None -> keep param dtype
                (numerically exact vs f32 reference); or an explicit dtype.

    Rebuild after any grow_layer / insert_layer / prune_neurons mutation.
    """
    n_layers = len(weights)
    assert n_layers == len(biases) and n_layers >= 1
    dims = [int(weights[0].shape[0])] + [int(w.shape[1]) for w in weights]
    for i, w in enumerate(weights):
        assert int(w.shape[0]) == dims[i], "layer dims must chain"

    if mxu_dtype == "auto":
        mxu_dtype = (jnp.bfloat16
                     if jnp.dtype(weights[0].dtype) == jnp.float32
                     else weights[0].dtype)
    elif mxu_dtype is None:
        mxu_dtype = weights[0].dtype

    # Lane-dense padding of every feature dim (zero padding is numerically exact:
    # padded input cols, padded weight rows/cols and padded biases are all zero).
    pdims = [_round_up(max(d, 1), _LANE) for d in dims]

    wps = []
    for i, w in enumerate(weights):
        wp = jnp.pad(w, ((0, pdims[i] - dims[i]), (0, pdims[i + 1] - dims[i + 1])))
        wps.append(wp.astype(mxu_dtype))

    max_out_pad = max(pdims[1:])
    b_stack = jnp.stack([
        jnp.pad(jnp.asarray(b, jnp.float32), (0, max_out_pad - int(b.shape[0])))
        for b in biases
    ])  # (L, max_out_pad), f32

    wps = [jax.block_until_ready(w) for w in wps]   # materialize once, now
    b_stack = jax.block_until_ready(b_stack)
    return {
        "weights": tuple(wps),
        "b_stack": b_stack,
        "dims": tuple(dims),
        "pdims": tuple(pdims),
    }


def _pick_tb(batch: int, sub: int) -> int:
    """Pick the batch tile: big tiles (fewer ~0.35us grid steps) but bounded
    ragged-edge waste; <=512 rows."""
    cands = sorted({_round_up(c, sub) for c in (64, 128, 256, 512, min(batch, 512))})
    best_tb, best_score = None, None
    for tb in cands:
        if tb <= 0:
            continue
        steps = -(-batch // tb)
        score = steps * tb + steps * 64   # rows of MXU work + ~64-row step overhead
        if best_score is None or score < best_score or (score == best_score and tb > best_tb):
            best_tb, best_score = tb, score
    return best_tb


# --------------------------------------------------------------------------- #
# Forward
# --------------------------------------------------------------------------- #
def growable_mlp_forward(x, prepared):
    """Fused MLP forward.  x: (batch, in_dim); prepared: prepare_growable_mlp()."""
    wps = prepared["weights"]
    b_stack = prepared["b_stack"]
    dims = prepared["dims"]
    pdims = prepared["pdims"]
    n_layers = len(wps)

    batch, in_dim = x.shape
    assert in_dim == dims[0], "input feature dim must match layer_dims[0]"

    out_dim, out_pad = dims[-1], pdims[-1]
    itemsize = jnp.dtype(x.dtype).itemsize

    # ---- batch tiling: no batch padding; ragged last tile handled by Pallas ----
    sub = _sublane(x.dtype)
    tb = _pick_tb(batch, sub)
    grid_n = pl.cdiv(batch, tb)
    # Give v7x megacore (2 TCs) at least 2 batch tiles to shard when possible.
    if grid_n == 1 and batch > sub:
        tb = _round_up(-(-batch // 2), sub)
        grid_n = pl.cdiv(batch, tb)
    grid = (grid_n,)

    # Only per-call data movement: pad x's feature dim to the lane multiple.
    xp = x if pdims[0] == in_dim else jnp.pad(x, ((0, 0), (0, pdims[0] - in_dim)))

    # ---- VMEM budget (per-generation cap, counting buffer multiplicities) ----
    resident = sum(w.size * w.dtype.itemsize for w in wps) + b_stack.size * 4
    act_tile = (tb * pdims[0] + tb * out_pad) * itemsize
    f32_tmp = 3 * tb * max(pdims) * 4

    def _vmem_limit(resident_bufs, act_bufs):
        try:
            cap = int(pltpu.get_tpu_info().vmem_capacity_bytes)
        except Exception:           # off-TPU / older API: assume the smallest (v7x)
            cap = 64 << 20
        cap = int(0.85 * cap)
        needed = resident * resident_bufs + act_tile * act_bufs + f32_tmp + (2 << 20)
        return int(min(max(needed, 32 << 20), cap))

    # ---- advisory cost estimate (true dims for flops, actual arrays for bytes) --
    flops = 2 * batch * sum(a * b for a, b in zip(dims[:-1], dims[1:]))
    bytes_accessed = (xp.size * xp.dtype.itemsize
                      + resident
                      + batch * out_pad * itemsize)
    cost = pl.CostEstimate(flops=flops, transcendentals=0,
                           bytes_accessed=bytes_accessed)

    kernel = functools.partial(_mlp_kernel, n_layers, tuple(pdims[1:]))
    out_shape = jax.ShapeDtypeStruct((batch, out_pad), x.dtype)

    def _run(use_pipeline_mode):
        res_kwargs, x_kwargs = {}, {}
        if use_pipeline_mode:
            # Residents have a constant index_map -> single buffer (halves their
            # VMEM footprint; matters on v7x's 64 MiB per-TC VMEM under megacore
            # duplication).
            res_kwargs = dict(pipeline_mode=pl.Buffered(1))
            if grid_n >= 3:
                # Only per-step traffic is the activation tile; deepen its pipeline.
                x_kwargs = dict(pipeline_mode=pl.Buffered(3))

        in_specs = [pl.BlockSpec((tb, pdims[0]), lambda i: (i, 0), **x_kwargs)]
        for wp in wps:
            in_specs.append(pl.BlockSpec(wp.shape, lambda i: (0, 0), **res_kwargs))
        in_specs.append(pl.BlockSpec(b_stack.shape, lambda i: (0, 0), **res_kwargs))
        out_specs = pl.BlockSpec((tb, out_pad), lambda i: (i, 0))

        res_bufs = 1 if use_pipeline_mode else 2
        act_bufs = 3 if (use_pipeline_mode and grid_n >= 3) else 2

        return pl.pallas_call(
            kernel,
            out_shape=out_shape,
            grid=grid,
            in_specs=in_specs,
            out_specs=out_specs,
            compiler_params=pltpu.CompilerParams(
                dimension_semantics=("parallel",),          # megacore-shard batch
                vmem_limit_bytes=_vmem_limit(res_bufs, act_bufs),
            ),
            cost_estimate=cost,
        )(xp, *wps, b_stack)

    try:
        out_padded = _run(True)
    except Exception:
        # pipeline_mode / Buffered(1) not supported on this JAX build: fall back
        # to default (double-buffered) specs -- correct, just heavier on VMEM.
        out_padded = _run(False)

    return out_padded if out_pad == out_dim else out_padded[:, :out_dim]


# --------------------------------------------------------------------------- #
# Module-equivalent init & pure-JAX reference
# --------------------------------------------------------------------------- #
def init_growable_mlp_params(layer_dims, key, dtype=jnp.float32):
    """Matches GrowableMLP.__init__: kaiming_normal_(nonlinearity='relu') weights
    (std = sqrt(2 / fan_in)), zero biases.  Weights returned transposed to
    (in_dim, out_dim)."""
    weights, biases = [], []
    for in_dim, out_dim in zip(layer_dims[:-1], layer_dims[1:]):
        key, sub = jax.random.split(key)
        std = (2.0 / in_dim) ** 0.5
        w_pt = std * jax.random.normal(sub, (out_dim, in_dim), dtype=dtype)
        weights.append(w_pt.T)
        biases.append(jnp.zeros((out_dim,), dtype=dtype))
    return weights, biases


def reference_forward(x, weights, biases):
    h = x
    n = len(weights)
    for i, (w, b) in enumerate(zip(weights, biases)):
        h = jnp.dot(h, w, precision=jax.lax.Precision.HIGHEST) + b
        if i < n - 1:
            h = jnp.maximum(h, 0.0)
    return h


# TODO(synk): grow_layer / insert_layer / prune_neurons are host-side parameter
# surgery, not kernel ops; after any mutation rebuild via prepare_growable_mlp()
# (the pallas_call re-traces for the new shapes).

if __name__ == "__main__":
    key = jax.random.PRNGKey(0)
    layer_dims = [16, 32, 32, 8]        # GrowableMLP([16, 32, 32, 8])
    batch = 8

    key, xkey, pkey, bkey = jax.random.split(key, 4)
    x = jax.random.normal(xkey, (batch, layer_dims[0]), dtype=jnp.float32)
    weights, biases = init_growable_mlp_params(layer_dims, pkey)
    # Use non-zero biases in the test so the bias path is numerically exercised
    # (the module inits them to zero; forward semantics are unchanged).
    biases = [0.1 * jax.random.normal(k, b.shape, dtype=b.dtype)
              for k, b in zip(jax.random.split(bkey, len(biases)), biases)]

    ref = reference_forward(x, weights, biases)

    # Exact mode: f32 MXU operands, matches the f32 reference tightly.
    prep_exact = prepare_growable_mlp(weights, biases, mxu_dtype=None)
    out_exact = jax.block_until_ready(growable_mlp_forward(x, prep_exact))
    assert out_exact.shape == (batch, layer_dims[-1])
    assert jnp.allclose(out_exact, ref, atol=1e-4, rtol=1e-4), "exact-mode mismatch"

    # Default fast mode: bf16 MXU operands + f32 accumulation (recommended on
    # v5e/v6e/v7x).  Params are prepared ONCE and reused across calls.
    prep_fast = prepare_growable_mlp(weights, biases)
    out_fast = jax.block_until_ready(growable_mlp_forward(x, prep_fast))
    out_fast = jax.block_until_ready(growable_mlp_forward(x, prep_fast))  # reuse
    assert out_fast.shape == (batch, layer_dims[-1])
    # bf16 operand rounding => small documented delta vs the f32 reference.
    assert jnp.allclose(out_fast, ref, atol=1e-1, rtol=1e-1), "fast-mode mismatch"

    print("KERNEL_OK")
</pallas_src>

<mosaic_0001>
module attributes {stable_mosaic.version = 11 : i64} {
  func.func @_mlp_kernel(%arg0: i32, %arg1: memref<8x128xf32, #tpu.memory_space<vmem>>, %arg2: memref<128x128xf32, #tpu.memory_space<vmem>>, %arg3: memref<128x128xf32, #tpu.memory_space<vmem>>, %arg4: memref<128x128xf32, #tpu.memory_space<vmem>>, %arg5: memref<3x128xf32, #tpu.memory_space<vmem>>, %arg6: memref<8x128xf32, #tpu.memory_space<vmem>>) attributes {dimension_semantics = [#tpu.dimension_semantics<parallel>], iteration_bounds = array<i64: 1>, scalar_prefetch = 0 : i64, scratch_operands = 0 : i64, tpu.core_type = #tpu.core_type<tc>, window_params = [{transform_indices = @transform_0, window_bounds = array<i64: 8, 128>}, {pipeline_mode = #tpu.pipeline_mode<synchronous>, transform_indices = @transform_1, window_bounds = array<i64: 128, 128>}, {pipeline_mode = #tpu.pipeline_mode<synchronous>, transform_indices = @transform_2, window_bounds = array<i64: 128, 128>}, {pipeline_mode = #tpu.pipeline_mode<synchronous>, transform_indices = @transform_3, window_bounds = array<i64: 128, 128>}, {pipeline_mode = #tpu.pipeline_mode<synchronous>, transform_indices = @transform_4, window_bounds = array<i64: 3, 128>}, {transform_indices = @transform_5, window_bounds = array<i64: 8, 128>}]} {
    %c0 = arith.constant 0 : index
    %c0_0 = arith.constant 0 : index
    %0 = vector.load %arg1[%c0, %c0_0] : memref<8x128xf32, #tpu.memory_space<vmem>>, vector<8x128xf32>
    %c0_1 = arith.constant 0 : index
    %c0_2 = arith.constant 0 : index
    %1 = vector.load %arg2[%c0_1, %c0_2] : memref<128x128xf32, #tpu.memory_space<vmem>>, vector<128x128xf32>
    %cst = arith.constant dense<0.000000e+00> : vector<8x128xf32>
    %2 = tpu.matmul %0, %1, %cst {dimension_numbers = #tpu.dot_dimension_numbers<[1], [0], [0], [1], [0, 0, 1, 1], [], []>} : vector<8x128xf32>, vector<128x128xf32>, vector<8x128xf32> -> vector<8x128xf32>
    %c0_3 = arith.constant 0 : index
    %c0_4 = arith.constant 0 : index
    %3 = vector.load %arg5[%c0_3, %c0_4] : memref<3x128xf32, #tpu.memory_space<vmem>>, vector<1x128xf32>
    %4 = vector.broadcast %3 : vector<1x128xf32> to vector<8x128xf32>
    %5 = arith.addf %2, %4 : vector<8x128xf32>
    %cst_5 = arith.constant 0.000000e+00 : f32
    %6 = vector.broadcast %cst_5 : f32 to vector<8x128xf32>
    %7 = arith.maximumf %5, %6 : vector<8x128xf32>
    %c0_6 = arith.constant 0 : index
    %c0_7 = arith.constant 0 : index
    %8 = vector.load %arg3[%c0_6, %c0_7] : memref<128x128xf32, #tpu.memory_space<vmem>>, vector<128x128xf32>
    %cst_8 = arith.constant dense<0.000000e+00> : vector<8x128xf32>
    %9 = tpu.matmul %7, %8, %cst_8 {dimension_numbers = #tpu.dot_dimension_numbers<[1], [0], [0], [1], [0, 0, 1, 1], [], []>} : vector<8x128xf32>, vector<128x128xf32>, vector<8x128xf32> -> vector<8x128xf32>
    %c1 = arith.constant 1 : index
    %c0_9 = arith.constant 0 : index
    %10 = vector.load %arg5[%c1, %c0_9] : memref<3x128xf32, #tpu.memory_space<vmem>>, vector<1x128xf32>
    %11 = vector.broadcast %10 : vector<1x128xf32> to vector<8x128xf32>
    %12 = arith.addf %9, %11 : vector<8x128xf32>
    %cst_10 = arith.constant 0.000000e+00 : f32
    %13 = vector.broadcast %cst_10 : f32 to vector<8x128xf32>
    %14 = arith.maximumf %12, %13 : vector<8x128xf32>
    %c0_11 = arith.constant 0 : index
    %c0_12 = arith.constant 0 : index
    %15 = vector.load %arg4[%c0_11, %c0_12] : memref<128x128xf32, #tpu.memory_space<vmem>>, vector<128x128xf32>
    %cst_13 = arith.constant dense<0.000000e+00> : vector<8x128xf32>
    %16 = tpu.matmul %14, %15, %cst_13 {dimension_numbers = #tpu.dot_dimension_numbers<[1], [0], [0], [1], [0, 0, 1, 1], [], []>} : vector<8x128xf32>, vector<128x128xf32>, vector<8x128xf32> -> vector<8x128xf32>
    %c2 = arith.constant 2 : index
    %c0_14 = arith.constant 0 : index
    %17 = vector.load %arg5[%c2, %c0_14] : memref<3x128xf32, #tpu.memory_space<vmem>>, vector<1x128xf32>
    %18 = vector.broadcast %17 : vector<1x128xf32> to vector<8x128xf32>
    %19 = arith.addf %16, %18 : vector<8x128xf32>
    %c0_15 = arith.constant 0 : index
    %c0_16 = arith.constant 0 : index
    %20 = vector.load %arg6[%c0_15, %c0_16] : memref<8x128xf32, #tpu.memory_space<vmem>>, vector<8x128xf32>
    tpu.vector_store %arg6[%c0_15, %c0_16], %19 {strides = array<i32>} : memref<8x128xf32, #tpu.memory_space<vmem>>, vector<8x128xf32>,
    return
  }
  func.func @transform_0(%arg0: i32) -> (i32, i32) {
    %c0_i32 = arith.constant 0 : i32
    %c0_i32_0 = arith.constant 0 : i32
    return %arg0, %c0_i32 : i32, i32
  }
  func.func @transform_1(%arg0: i32) -> (i32, i32) {
    %c0_i32 = arith.constant 0 : i32
    %c0_i32_0 = arith.constant 0 : i32
    %c0_i32_1 = arith.constant 0 : i32
    return %c0_i32, %c0_i32_0 : i32, i32
  }
  func.func @transform_2(%arg0: i32) -> (i32, i32) {
    %c0_i32 = arith.constant 0 : i32
    %c0_i32_0 = arith.constant 0 : i32
    %c0_i32_1 = arith.constant 0 : i32
    return %c0_i32, %c0_i32_0 : i32, i32
  }
  func.func @transform_3(%arg0: i32) -> (i32, i32) {
    %c0_i32 = arith.constant 0 : i32
    %c0_i32_0 = arith.constant 0 : i32
    %c0_i32_1 = arith.constant 0 : i32
    return %c0_i32, %c0_i32_0 : i32, i32
  }
  func.func @transform_4(%arg0: i32) -> (i32, i32) {
    %c0_i32 = arith.constant 0 : i32
    %c0_i32_0 = arith.constant 0 : i32
    %c0_i32_1 = arith.constant 0 : i32
    return %c0_i32, %c0_i32_0 : i32, i32
  }
  func.func @transform_5(%arg0: i32) -> (i32, i32) {
    %c0_i32 = arith.constant 0 : i32
    %c0_i32_0 = arith.constant 0 : i32
    return %arg0, %c0_i32 : i32, i32
  }
}

module attributes {stable_mosaic.version = 11 : i64} {
  func.func @_mlp_kernel(%arg0: i32, %arg1: memref<8x128xf32, #tpu.memory_space<vmem>>, %arg2: memref<128x128xf32, #tpu.memory_space<vmem>>, %arg3: memref<128x128xf32, #tpu.memory_space<vmem>>, %arg4: memref<128x128xf32, #tpu.memory_space<vmem>>, %arg5: memref<3x128xf32, #tpu.memory_space<vmem>>, %arg6: memref<8x128xf32, #tpu.memory_space<vmem>>) attributes {dimension_semantics = [#tpu.dimension_semantics<parallel>], iteration_bounds = array<i64: 1>, scalar_prefetch = 0 : i64, scratch_operands = 0 : i64, tpu.core_type = #tpu.core_type<tc>, window_params = [{transform_indices = @transform_0, window_bounds = array<i64: 8, 128>}, {pipeline_mode = #tpu.pipeline_mode<synchronous>, transform_indices = @transform_1, window_bounds = array<i64: 128, 128>}, {pipeline_mode = #tpu.pipeline_mode<synchronous>, transform_indices = @transform_2, window_bounds = array<i64: 128, 128>}, {pipeline_mode = #tpu.pipeline_mode<synchronous>, transform_indices = @transform_3, window_bounds = array<i64: 128, 128>}, {pipeline_mode = #tpu.pipeline_mode<synchronous>, transform_indices = @transform_4, window_bounds = array<i64: 3, 128>}, {transform_indices = @transform_5, window_bounds = array<i64: 8, 128>}]} {
    %c0 = arith.constant 0 : index
    %c0_0 = arith.constant 0 : index
    %0 = vector.load %arg1[%c0, %c0_0] : memref<8x128xf32, #tpu.memory_space<vmem>>, vector<8x128xf32>
    %c0_1 = arith.constant 0 : index
    %c0_2 = arith.constant 0 : index
    %1 = vector.load %arg2[%c0_1, %c0_2] : memref<128x128xf32, #tpu.memory_space<vmem>>, vector<128x128xf32>
    %cst = arith.constant dense<0.000000e+00> : vector<8x128xf32>
    %2 = tpu.matmul %0, %1, %cst {dimension_numbers = #tpu.dot_dimension_numbers<[1], [0], [0], [1], [0, 0, 1, 1], [], []>} : vector<8x128xf32>, vector<128x128xf32>, vector<8x128xf32> -> vector<8x128xf32>
    %c0_3 = arith.constant 0 : index
    %c0_4 = arith.constant 0 : index
    %3 = vector.load %arg5[%c0_3, %c0_4] : memref<3x128xf32, #tpu.memory_space<vmem>>, vector<1x128xf32>
    %4 = vector.broadcast %3 : vector<1x128xf32> to vector<8x128xf32>
    %5 = arith.addf %2, %4 : vector<8x128xf32>
    %cst_5 = arith.constant 0.000000e+00 : f32
    %6 = vector.broadcast %cst_5 : f32 to vector<8x128xf32>
    %7 = arith.maximumf %5, %6 : vector<8x128xf32>
    %c0_6 = arith.constant 0 : index
    %c0_7 = arith.constant 0 : index
    %8 = vector.load %arg3[%c0_6, %c0_7] : memref<128x128xf32, #tpu.memory_space<vmem>>, vector<128x128xf32>
    %cst_8 = arith.constant dense<0.000000e+00> : vector<8x128xf32>
    %9 = tpu.matmul %7, %8, %cst_8 {dimension_numbers = #tpu.dot_dimension_numbers<[1], [0], [0], [1], [0, 0, 1, 1], [], []>} : vector<8x128xf32>, vector<128x128xf32>, vector<8x128xf32> -> vector<8x128xf32>
    %c1 = arith.constant 1 : index
    %c0_9 = arith.constant 0 : index
    %10 = vector.load %arg5[%c1, %c0_9] : memref<3x128xf32, #tpu.memory_space<vmem>>, vector<1x128xf32>
    %11 = vector.broadcast %10 : vector<1x128xf32> to vector<8x128xf32>
    %12 = arith.addf %9, %11 : vector<8x128xf32>
    %cst_10 = arith.constant 0.000000e+00 : f32
    %13 = vector.broadcast %cst_10 : f32 to vector<8x128xf32>
    %14 = arith.maximumf %12, %13 : vector<8x128xf32>
    %c0_11 = arith.constant 0 : index
    %c0_12 = arith.constant 0 : index
    %15 = vector.load %arg4[%c0_11, %c0_12] : memref<128x128xf32, #tpu.memory_space<vmem>>, vector<128x128xf32>
    %cst_13 = arith.constant dense<0.000000e+00> : vector<8x128xf32>
    %16 = tpu.matmul %14, %15, %cst_13 {dimension_numbers = #tpu.dot_dimension_numbers<[1], [0], [0], [1], [0, 0, 1, 1], [], []>} : vector<8x128xf32>, vector<128x128xf32>, vector<8x128xf32> -> vector<8x128xf32>
    %c2 = arith.constant 2 : index
    %c0_14 = arith.constant 0 : index
    %17 = vector.load %arg5[%c2, %c0_14] : memref<3x128xf32, #tpu.memory_space<vmem>>, vector<1x128xf32>
    %18 = vector.broadcast %17 : vector<1x128xf32> to vector<8x128xf32>
    %19 = arith.addf %16, %18 : vector<8x128xf32>
    %c0_15 = arith.constant 0 : index
    %c0_16 = arith.constant 0 : index
    %20 = vector.load %arg6[%c0_15, %c0_16] : memref<8x128xf32, #tpu.memory_space<vmem>>, vector<8x128xf32>
    tpu.vector_store %arg6[%c0_15, %c0_16], %19 {strides = array<i32>} : memref<8x128xf32, #tpu.memory_space<vmem>>, vector<8x128xf32>,
    return
  }
  func.func @transform_0(%arg0: i32) -> (i32, i32) {
    %c0_i32 = arith.constant 0 : i32
    %c0_i32_0 = arith.constant 0 : i32
    return %arg0, %c0_i32 : i32, i32
  }
  func.func @transform_1(%arg0: i32) -> (i32, i32) {
    %c0_i32 = arith.constant 0 : i32
    %c0_i32_0 = arith.constant 0 : i32
    %c0_i32_1 = arith.constant 0 : i32
    return %c0_i32, %c0_i32_0 : i32, i32
  }
  func.func @transform_2(%arg0: i32) -> (i32, i32) {
    %c0_i32 = arith.constant 0 : i32
    %c0_i32_0 = arith.constant 0 : i32
    %c0_i32_1 = arith.constant 0 : i32
    return %c0_i32, %c0_i32_0 : i32, i32
  }
  func.func @transform_3(%arg0: i32) -> (i32, i32) {
    %c0_i32 = arith.constant 0 : i32
    %c0_i32_0 = arith.constant 0 : i32
    %c0_i32_1 = arith.constant 0 : i32
    return %c0_i32, %c0_i32_0 : i32, i32
  }
  func.func @transform_4(%arg0: i32) -> (i32, i32) {
    %c0_i32 = arith.constant 0 : i32
    %c0_i32_0 = arith.constant 0 : i32
    %c0_i32_1 = arith.constant 0 : i32
    return %c0_i32, %c0_i32_0 : i32, i32
  }
  func.func @transform_5(%arg0: i32) -> (i32, i32) {
    %c0_i32 = arith.constant 0 : i32
    %c0_i32_0 = arith.constant 0 : i32
    return %arg0, %c0_i32 : i32, i32
  }
}

</mosaic_0001>

<bundles_post_ra>
// kernel: tpu_custom_call.1
= control target key start
LH: loop header
LB: loop body
LE: loop exit
PB: predicated region body
PF: predicated region fallthrough
CT: control target
= control target key end

     0   :  { %10 = vsyncpa [#allocation3], 0  ;;  %s875_s0 = inlined_call_operand.hbm [shape: f32[8,128], index: 0, kind: input, shape index: {}]   ;;  %s876_s1 = inlined_call_operand.hbm [shape: f32[128,128], index: 1, kind: input, shape index: {}]   ;;  %s877_s2 = inlined_call_operand.hbm [shape: f32[128,128], index: 2, kind: input, shape index: {}]   ;;  %s878_s3 = inlined_call_operand.hbm [shape: f32[128,128], index: 3, kind: input, shape index: {}]   ;;  %s879_s4 = inlined_call_operand.vmem [shape: f32[3,128], index: 4, kind: input, shape index: {}]   ;;  %s880_s5 = inlined_call_operand.hbm [shape: f32[8,128], index: 5, kind: output, shape index: {}]  }
   0x1   :  { %11 = vsyncpa [#allocation6], 0 }
   0x2   :  { %12 = vsyncpa [#allocation9], 0 }
   0x3   :  { %13 = vsyncpa [#allocation4], 0  ;;  %s727_s18 = smov [#allocation5]   ;;  %s609_s22 = scalar_lea.hbm %s876_s1, 2048 }
   0x4   :  { %s29_s19 = sshll.u32 %s727_s18, 4  ;;  %p610_p0 = scmp.ne.s32.totalorder %s876_s1, %s609_s22  ;;  %s30_s19 = int_to_ptr.vmem [resolvable:$true] %s29_s19 }
   0x5   :  { %p613_p1 = scmp.lt.u32.totalorder %s609_s22, %s876_s1 }
   0x7   :  { %p615_p2 = pnand %p613_p1, %p610_p0 }
   0x9   :  { %618 = shalt.err (!%p615_p2)
}
   0xa   :  { %s619_s27 = scalar_lea.vmem %s30_s19, 2048  ;;  %p624_p4 = scmp.lt.s32.totalorder %s30_s19, %s30_s19 }
   0xb   :  { %p620_p3 = scmp.ne.s32.totalorder %s30_s19, %s619_s27  ;;  %p625_p5 = scmp.lt.s32.totalorder %s619_s27, %s619_s27 }
   0xd   :  { %p626_p6 = por %p625_p5, %p624_p4 }
   0xf   :  { %p627_p7 = pnand %p626_p6, %p620_p3 }
  0x11   :  { %630 = shalt.err (!%p627_p7)
}
  0x12   :  { %s728_s28 = smov 128   ;;  %s729_s29 = smov 8  }
  0x13   :  { %35 = dma.hbm_to_vmem [thread:$0]  %s876_s1, 2048, %s30_s19, [#allocation6], %s728_s28, %s728_s28, %s729_s29  }
  0x14   :  { %s730_s7 = smov [#allocation2]   ;;  %s731_s9 = smov [#allocation7]  }
  0x15   :  { %s20_s8 = sshll.u32 %s730_s7, 4  ;;  %s41_s10 = sshll.u32 %s731_s9, 4  ;;  %s21_s8 = int_to_ptr.vmem [resolvable:$true] %s20_s8  ;;  %s42_s10 = int_to_ptr.vmem [resolvable:$true] %s41_s10 }
  0x16   :  { %s631_s13 = scalar_lea.hbm %s875_s0, 128 }
  0x17   :  { %p632_p8 = scmp.ne.s32.totalorder %s875_s0, %s631_s13  ;;  %p635_p9 = scmp.lt.u32.totalorder %s631_s13, %s875_s0 }
  0x19   :  { %p637_p10 = pnand %p635_p9, %p632_p8 }
  0x1b   :  { %640 = shalt.err (!%p637_p10)
}
  0x1c   :  { %s641_s1 = scalar_lea.vmem %s21_s8, 128  ;;  %p646_p12 = scmp.lt.s32.totalorder %s21_s8, %s21_s8 }
  0x1d   :  { %p642_p11 = scmp.ne.s32.totalorder %s21_s8, %s641_s1  ;;  %p647_p13 = scmp.lt.s32.totalorder %s641_s1, %s641_s1 }
  0x1f   :  { %p648_p0 = por %p647_p13, %p646_p12 }
  0x21   :  { %p649_p1 = pnand %p648_p0, %p642_p11 }
  0x23   :  { %652 = shalt.err (!%p649_p1)
}
  0x24   :  { %23 = dma.hbm_to_vmem [thread:$0]  %s875_s0, 128, %s21_s8, [#allocation3]  }
  0x25   :  { %s653_s22 = scalar_lea.hbm %s877_s2, 2048 }
  0x26   :  { %p654_p2 = scmp.ne.s32.totalorder %s877_s2, %s653_s22  ;;  %p657_p3 = scmp.lt.u32.totalorder %s653_s22, %s877_s2 }
  0x28   :  { %p659_p4 = pnand %p657_p3, %p654_p2 }
  0x2a   :  { %662 = shalt.err (!%p659_p4)
}
  0x2b   :  { %s663_s27 = scalar_lea.vmem %s42_s10, 2048  ;;  %p668_p6 = scmp.lt.s32.totalorder %s42_s10, %s42_s10 }
  0x2c   :  { %p664_p5 = scmp.ne.s32.totalorder %s42_s10, %s663_s27  ;;  %p669_p7 = scmp.lt.s32.totalorder %s663_s27, %s663_s27 }
  0x2e   :  { %p670_p8 = por %p669_p7, %p668_p6 }
  0x30   :  { %p671_p9 = pnand %p670_p8, %p664_p5 }
  0x32   :  { %674 = shalt.err (!%p671_p9)
}
  0x33   :  { %47 = dma.hbm_to_vmem [thread:$0]  %s877_s2, 2048, %s42_s10, [#allocation6], %s728_s28, %s728_s28, %s729_s29  }
  0x34   :  { %s732_s6 = smov [#allocation8]   ;;  %s675_s11 = scalar_lea.hbm %s878_s3, 2048 }
  0x35   :  { %s53_s7 = sshll.u32 %s732_s6, 4  ;;  %p676_p10 = scmp.ne.s32.totalorder %s878_s3, %s675_s11  ;;  %s54_s7 = int_to_ptr.vmem [resolvable:$true] %s53_s7 }
  0x36   :  { %p679_p11 = scmp.lt.u32.totalorder %s675_s11, %s878_s3 }
  0x38   :  { %p681_p12 = pnand %p679_p11, %p676_p10 }
  0x3a   :  { %684 = shalt.err (!%p681_p12)
}
  0x3b   :  { %s685_s16 = scalar_lea.vmem %s54_s7, 2048  ;;  %p690_p0 = scmp.lt.s32.totalorder %s54_s7, %s54_s7 }
  0x3c   :  { %p686_p13 = scmp.ne.s32.totalorder %s54_s7, %s685_s16  ;;  %p691_p1 = scmp.lt.s32.totalorder %s685_s16, %s685_s16 }
  0x3e   :  { %p692_p2 = por %p691_p1, %p690_p0 }
  0x40   :  { %p693_p3 = pnand %p692_p2, %p686_p13 }
  0x42   :  { %696 = shalt.err (!%p693_p3)
}
  0x43   :  { %59 = dma.hbm_to_vmem [thread:$0]  %s878_s3, 2048, %s54_s7, [#allocation9], %s728_s28, %s728_s28, %s729_s29  }
  0x44   :  { %719 = dma.done.wait [#allocation3], 128  }
  0x45   :  { %720 = vsyncadd [#allocation3], 4294967168 }
  0x46   :  { %721 = dma.done.wait [#allocation6], 4096  }
  0x47   :  { %722 = vsyncadd [#allocation6], 4294963200 }
  0x48   :  { %723 = dma.done.wait [#allocation9], 2048  }
  0x49   :  { %724 = vsyncadd [#allocation9], 4294965248  ;;  %v733_v0 = vmov 0.0|0.0   ;;  %vm734_vm0 = vmmov 0   ;;  %v735_v1 = vmov 0.0   ;;  %v75_v2 = vld [vmem:[#allocation5] sm:$0xff] }
  0x4a   :  { %527 = vmatprep.subr.bf16.mxu0 %v733_v0  ;;  %454 = vmatprep.mubr.msk.f32.mxu0 %vm734_vm0, %v735_v1  ;;  %v76_v3 = vld [vmem:[#allocation5 + $0x8] sm:$0xff]  ;;  %v77_v4 = vld [vmem:[#allocation5 + $0x10] sm:$0xff]  ;;  %v78_v6 = vld [vmem:[#allocation5 + $0x18] sm:$0xff]  ;;  %s736_s19 = smov [#allocation10]  }
  0x4b   :  { %551 = vmatprep.subr.bf16.mxu1 %v733_v0  ;;  %489 = vmatprep.mubr.msk.f32.mxu1 %vm734_vm0, %v735_v1  ;;  %v528_v5 = vpack.c.bf16 %v76_v3, %v75_v2  ;;  %v531_v7 = vpack.c.bf16 %v78_v6, %v77_v4  ;;  %v79_v8 = vld [vmem:[#allocation5 + $0x20] sm:$0xff]  ;;  %v80_v9 = vld [vmem:[#allocation5 + $0x28] sm:$0xff]  ;;  %v169_v12 = vld [vmem:[#allocation7 + $0x10] sm:$0xff]  ;;  %s357_s20 = sshll.u32 %s736_s19, 4  ;;  %s358_s20 = int_to_ptr.vmem [resolvable:$true] %s357_s20 }
  0x4c   :  { %v167_v10 = vld [vmem:[#allocation7] sm:$0xff]  ;;  %v168_v11 = vld [vmem:[#allocation7 + $0x8] sm:$0xff]  ;;  %v170_v13 = vld [vmem:[#allocation7 + $0x18] sm:$0xff]  ;;  %v534_v14 = vpack.c.bf16 %v80_v9, %v79_v8  ;;  %s697_s21 = scalar_lea.vmem %s358_s20, 128  ;;  %p702_p5 = scmp.lt.s32.totalorder %s358_s20, %s358_s20 }
  0x4d   :  { %529 = vmatpush3.bf16.msra.mxu0 %v528_v5  ;;  %v552_v15 = vpack.c.bf16 %v168_v11, %v167_v10  ;;  %v81_v16 = vld [vmem:[#allocation5 + $0x30] sm:$0xff]  ;;  %v82_v17 = vld [vmem:[#allocation5 + $0x38] sm:$0xff]  ;;  %v555_v18 = vpack.c.bf16 %v170_v13, %v169_v12  ;;  %v171_v19 = vld [vmem:[#allocation7 + $0x20] sm:$0xff]  ;;  %p698_p4 = scmp.ne.s32.totalorder %s358_s20, %s697_s21  ;;  %p703_p6 = scmp.lt.s32.totalorder %s697_s21, %s697_s21 }
  0x4e   :  { %530 = vmatprep.subr.bf16.mxu0 %v733_v0  ;;  %v172_v20 = vld [vmem:[#allocation7 + $0x28] sm:$0xff]  ;;  %v537_v21 = vpack.c.bf16 %v82_v17, %v81_v16  ;;  %v83_v22 = vld [vmem:[#allocation5 + $0x40] sm:$0xff]  ;;  %v173_v25 = vld [vmem:[#allocation7 + $0x30] sm:$0xff] }
  0x4f   :  { %553 = vmatpush3.bf16.msra.mxu1 %v552_v15  ;;  %v84_v23 = vld [vmem:[#allocation5 + $0x48] sm:$0xff]  ;;  %v558_v24 = vpack.c.bf16 %v172_v20, %v171_v19  ;;  %v174_v26 = vld [vmem:[#allocation7 + $0x38] sm:$0xff]  ;;  %v85_v28 = vld [vmem:[#allocation5 + $0x50] sm:$0xff]  ;;  %p704_p7 = por %p703_p6, %p702_p5 }
  0x50   :  { %554 = vmatprep.subr.bf16.mxu1 %v733_v0  ;;  %v540_v27 = vpack.c.bf16 %v84_v23, %v83_v22  ;;  %v86_v29 = vld [vmem:[#allocation5 + $0x58] sm:$0xff]  ;;  %v561_v30 = vpack.c.bf16 %v174_v26, %v173_v25  ;;  %v175_v31 = vld [vmem:[#allocation7 + $0x40] sm:$0xff]  ;;  %v176_v32 = vld [vmem:[#allocation7 + $0x48] sm:$0xff] }
  0x51   :  { %532 = vmatpush3.bf16.msra.mxu0 %v531_v7  ;;  %v543_v33 = vpack.c.bf16 %v86_v29, %v85_v28  ;;  %v87_v34 = vld [vmem:[#allocation5 + $0x60] sm:$0xff]  ;;  %v88_v35 = vld [vmem:[#allocation5 + $0x68] sm:$0xff]  ;;  %v564_v36 = vpack.c.bf16 %v176_v32, %v175_v31  ;;  %v177_v37 = vld [vmem:[#allocation7 + $0x50] sm:$0xff]  ;;  %p705_p8 = pnand %p704_p7, %p698_p4 }
  0x52   :  { %533 = vmatprep.subr.bf16.mxu0 %v733_v0  ;;  %v178_v38 = vld [vmem:[#allocation7 + $0x58] sm:$0xff]  ;;  %v546_v39 = vpack.c.bf16 %v88_v35, %v87_v34  ;;  %v89_v40 = vld [vmem:[#allocation5 + $0x70] sm:$0xff]  ;;  %v179_v43 = vld [vmem:[#allocation7 + $0x60] sm:$0xff] }
  0x53   :  { %556 = vmatpush3.bf16.msra.mxu1 %v555_v18  ;;  %v90_v41 = vld [vmem:[#allocation5 + $0x78] sm:$0xff]  ;;  %v567_v42 = vpack.c.bf16 %v178_v38, %v177_v37  ;;  %v180_v44 = vld [vmem:[#allocation7 + $0x68] sm:$0xff]  ;;  %v181_v48 = vld [vmem:[#allocation7 + $0x70] sm:$0xff] }
  0x54   :  { %557 = vmatprep.subr.bf16.mxu1 %v733_v0  ;;  %v549_v45 = vpack.c.bf16 %v90_v41, %v89_v40  ;;  %v570_v46 = vpack.c.bf16 %v180_v44, %v179_v43  ;;  %v74_v47 = vld [vmem:[#allocation2] sm:$0xff]  ;;  %v259_v51 = vld [vmem:[#allocation8] sm:$0xff]  ;;  %v260_v52 = vld [vmem:[#allocation8 + $0x8] sm:$0xff] }
  0x55   :  { %535 = vmatpush3.bf16.msra.mxu0 %v534_v14  ;;  %v182_v49 = vld [vmem:[#allocation7 + $0x78] sm:$0xff]  ;;  %v261_v53 = vld [vmem:[#allocation8 + $0x10] sm:$0xff]  ;;  %v576_v54 = vpack.c.bf16 %v260_v52, %v259_v51  ;;  %v263_v57 = vld [vmem:[#allocation8 + $0x20] sm:$0xff] }
  0x56   :  { %536 = vmatprep.subr.bf16.mxu0 %v733_v0  ;;  %v573_v50 = vpack.c.bf16 %v182_v49, %v181_v48  ;;  %v262_v55 = vld [vmem:[#allocation8 + $0x18] sm:$0xff]  ;;  %v264_v58 = vld [vmem:[#allocation8 + $0x28] sm:$0xff]  ;;  %v265_v60 = vld [vmem:[#allocation8 + $0x30] sm:$0xff] }
  0x57   :  { %559 = vmatpush3.bf16.msra.mxu1 %v558_v24  ;;  %v579_v56 = vpack.c.bf16 %v262_v55, %v261_v53  ;;  %v582_v59 = vpack.c.bf16 %v264_v58, %v263_v57  ;;  %v266_v61 = vld [vmem:[#allocation8 + $0x38] sm:$0xff]  ;;  %v267_v63 = vld [vmem:[#allocation8 + $0x40] sm:$0xff]  ;;  %v269_v3 = vld [vmem:[#allocation8 + $0x50] sm:$0xff] }
  0x58   :  { %560 = vmatprep.subr.bf16.mxu1 %v733_v0  ;;  %v585_v62 = vpack.c.bf16 %v266_v61, %v265_v60  ;;  %v270_v4 = vld [vmem:[#allocation8 + $0x58] sm:$0xff]  ;;  %v271_v6 = vld [vmem:[#allocation8 + $0x60] sm:$0xff]  ;;  %v272_v7 = vld [vmem:[#allocation8 + $0x68] sm:$0xff] }
  0x59   :  { %538 = vmatpush3.bf16.msra.mxu0 %v537_v21  ;;  %v591_v5 = vpack.c.bf16 %v270_v4, %v269_v3  ;;  %v594_v8 = vpack.c.bf16 %v272_v7, %v271_v6  ;;  %v368_v9 = vld [vmem:[%s879_s4] ss:$0 sm:$0xff]  ;;  %v273_v14 = vld [vmem:[#allocation8 + $0x70] sm:$0xff]  ;;  %v369_v17 = vld [vmem:[%s879_s4 + $0x1] ss:$0 sm:$0xff] }
  0x5a   :  { %539 = vmatprep.subr.bf16.mxu0 %v733_v0  ;;  %v274_v15 = vld [vmem:[#allocation8 + $0x78] sm:$0xff] }
  0x5b   :  { %562 = vmatpush3.bf16.msra.mxu1 %v561_v30  ;;  %v597_v16 = vpack.c.bf16 %v274_v15, %v273_v14  ;;  %v370_v21 = vld [vmem:[%s879_s4 + $0x2] ss:$0 sm:$0xff] }
  0x5c   :  { %563 = vmatprep.subr.bf16.mxu1 %v733_v0 }
  0x5d   :  { %541 = vmatpush3.bf16.msra.mxu0 %v540_v27 }
  0x5e   :  { %542 = vmatprep.subr.bf16.mxu0 %v733_v0 }
  0x5f   :  { %565 = vmatpush3.bf16.msra.mxu1 %v564_v36 }
  0x60   :  { %566 = vmatprep.subr.bf16.mxu1 %v733_v0 }
  0x61   :  { %544 = vmatpush3.bf16.msra.mxu0 %v543_v33 }
  0x62   :  { %545 = vmatprep.subr.bf16.mxu0 %v733_v0 }
  0x63   :  { %568 = vmatpush3.bf16.msra.mxu1 %v567_v42 }
  0x64   :  { %569 = vmatprep.subr.bf16.mxu1 %v733_v0 }
  0x65   :  { %547 = vmatpush3.bf16.msra.mxu0 %v546_v39 }
  0x66   :  { %548 = vmatprep.subr.bf16.mxu0 %v733_v0 }
  0x67   :  { %571 = vmatpush3.bf16.msra.mxu1 %v570_v46 }
  0x68   :  { %572 = vmatprep.subr.bf16.mxu1 %v733_v0 }
  0x69   :  { %550 = vmatpush3.bf16.msra.mxu0 %v549_v45 }
  0x6a   :  { %575 = vmatprep.subr.bf16.mxu0 %v733_v0 }
  0x6b   :  { %574 = vmatpush3.bf16.msra.mxu1 %v573_v50 }
  0x6c   :  { %455 = vmatmul.mubr.f32.vlgmr.msra.gmra.mrb[0].mxu0 %v74_v47 }
  0x6d   :  { %524 = vmatprep.mubr.msk.f32.mxu0 %vm734_vm0, %v735_v1  ;;  %577 = vmatpush3.bf16.msra.mxu0 %v576_v54  ;;  %v268_v1 = vld [vmem:[#allocation8 + $0x48] sm:$0xff] }
  0x6e   :  { %578 = vmatprep.subr.bf16.mxu0 %v733_v0  ;;  %v588_v2 = vpack.c.bf16 %v268_v1, %v267_v63 }
  0x71   :  { %580 = vmatpush3.bf16.msra.mxu0 %v579_v56 }
  0x72   :  { %581 = vmatprep.subr.bf16.mxu0 %v733_v0 }
  0x75   :  { %583 = vmatpush3.bf16.msra.mxu0 %v582_v59 }
  0x76   :  { %584 = vmatprep.subr.bf16.mxu0 %v733_v0 }
  0x79   :  { %586 = vmatpush3.bf16.msra.mxu0 %v585_v62 }
  0x7a   :  { %587 = vmatprep.subr.bf16.mxu0 %v733_v0 }
  0x7d   :  { %589 = vmatpush3.bf16.msra.mxu0 %v588_v2 }
  0x7e   :  { %590 = vmatprep.subr.bf16.mxu0 %v733_v0 }
  0x81   :  { %592 = vmatpush3.bf16.msra.mxu0 %v591_v5 }
  0x82   :  { %593 = vmatprep.subr.bf16.mxu0 %v733_v0 }
  0x85   :  { %595 = vmatpush3.bf16.msra.mxu0 %v594_v8 }
  0x86   :  { %596 = vmatprep.subr.bf16.mxu0 %v733_v0 }
  0x89   :  { %598 = vmatpush3.bf16.msra.mxu0 %v597_v16 }
 0x13f   :  { %v162_v10 = vpop.f32.mrb[0].mxu0 }
 0x140   :  { %v163_v11 = vadd.f32 %v368_v9, %v162_v10  ;;  %v456_v12 = vpop.f32.mrb[1].mxu0 }
 0x142   :  { %v166_v13 = vmax.f32 %v163_v11, 0.0 }
 0x144   :  { %490 = vmatmul.mubr.f32.vlgmr.msra.gmra.mrb[0].mxu1 %v166_v13 }
 0x217   :  { %v254_v18 = vpop.f32.mrb[0].mxu1 }
 0x218   :  { %v255_v19 = vadd.f32 %v369_v17, %v254_v18  ;;  %v491_v0 = vpop.f32.mrb[1].mxu1 }
 0x21a   :  { %v258_v20 = vmax.f32 %v255_v19, 0.0 }
 0x21c   :  { %525 = vmatmul.mubr.f32.vlgmr.msra.gmra.mrb[2].mxu0 %v258_v20 }
 0x2ef   :  { %v346_v22 = vpop.f32.mrb[2].mxu0 }
 0x2f0   :  { %v347_v23 = vadd.f32 %v370_v21, %v346_v22  ;;  %v526_v24 = vpop.f32.mrb[3].mxu0 }
 0x2f2   :  { %350 = vst [vmem:[#allocation10] sm:$0xff] %v347_v23 }
 0x2f3   :  { %708 = shalt.err (!%p705_p8)
}
 0x2f4   :  { %s709_s24 = scalar_lea.hbm %s880_s5, 128 }
 0x2f5   :  { %p710_p9 = scmp.ne.s32.totalorder %s880_s5, %s709_s24  ;;  %p713_p10 = scmp.lt.u32.totalorder %s709_s24, %s880_s5 }
 0x2f7   :  { %p715_p11 = pnand %p713_p10, %p710_p9 }
 0x2f9   :  { %718 = shalt.err (!%p715_p11)
}
 0x2fa   :  { %360 = dma.vmem_to_hbm [thread:$0]  %s358_s20, 128, %s880_s5, [#allocation4]  }
 0x2fb   :  { %725 = dma.done.wait [#allocation4], 128  }
 0x2fc   :  { %726 = vsyncadd [#allocation4], 4294967168 }
 0x2fd   :  { %364 = vsyncpa [#allocation3], 1 }
 0x2fe   :  { %365 = vsyncpa [#allocation6], 1 }
 0x2ff   :  { %366 = vsyncpa [#allocation9], 1 }
 0x300   :  { %367 = vsyncpa [#allocation4], 1 }

// kernel: tpu_custom_call.1
= control target key start
LH: loop header
LB: loop body
LE: loop exit
PB: predicated region body
PF: predicated region fallthrough
CT: control target
= control target key end

     0   :  { %10 = vsyncpa [#allocation3], 0  ;;  %s875_s0 = inlined_call_operand.hbm [shape: f32[8,128], index: 0, kind: input, shape index: {}]   ;;  %s876_s1 = inlined_call_operand.hbm [shape: f32[128,128], index: 1, kind: input, shape index: {}]   ;;  %s877_s2 = inlined_call_operand.hbm [shape: f32[128,128], index: 2, kind: input, shape index: {}]   ;;  %s878_s3 = inlined_call_operand.hbm [shape: f32[128,128], index: 3, kind: input, shape index: {}]   ;;  %s879_s4 = inlined_call_operand.vmem [shape: f32[3,128], index: 4, kind: input, shape index: {}]   ;;  %s880_s5 = inlined_call_operand.hbm [shape: f32[8,128], index: 5, kind: output, shape index: {}]  }
   0x1   :  { %11 = vsyncpa [#allocation6], 0 }
   0x2   :  { %12 = vsyncpa [#allocation9], 0 }
   0x3   :  { %13 = vsyncpa [#allocation4], 0  ;;  %s727_s18 = smov [#allocation5]   ;;  %s609_s22 = scalar_lea.hbm %s876_s1, 2048 }
   0x4   :  { %s29_s19 = sshll.u32 %s727_s18, 4  ;;  %p610_p0 = scmp.ne.s32.totalorder %s876_s1, %s609_s22  ;;  %s30_s19 = int_to_ptr.vmem [resolvable:$true] %s29_s19 }
   0x5   :  { %p613_p1 = scmp.lt.u32.totalorder %s609_s22, %s876_s1 }
   0x7   :  { %p615_p2 = pnand %p613_p1, %p610_p0 }
   0x9   :  { %618 = shalt.err (!%p615_p2)
}
   0xa   :  { %s619_s27 = scalar_lea.vmem %s30_s19, 2048  ;;  %p624_p4 = scmp.lt.s32.totalorder %s30_s19, %s30_s19 }
   0xb   :  { %p620_p3 = scmp.ne.s32.totalorder %s30_s19, %s619_s27  ;;  %p625_p5 = scmp.lt.s32.totalorder %s619_s27, %s619_s27 }
   0xd   :  { %p626_p6 = por %p625_p5, %p624_p4 }
   0xf   :  { %p627_p7 = pnand %p626_p6, %p620_p3 }
  0x11   :  { %630 = shalt.err (!%p627_p7)
}
  0x12   :  { %s728_s28 = smov 128   ;;  %s729_s29 = smov 8  }
  0x13   :  { %35 = dma.hbm_to_vmem [thread:$0]  %s876_s1, 2048, %s30_s19, [#allocation6], %s728_s28, %s728_s28, %s729_s29  }
  0x14   :  { %s730_s7 = smov [#allocation2]   ;;  %s731_s9 = smov [#allocation7]  }
  0x15   :  { %s20_s8 = sshll.u32 %s730_s7, 4  ;;  %s41_s10 = sshll.u32 %s731_s9, 4  ;;  %s21_s8 = int_to_ptr.vmem [resolvable:$true] %s20_s8  ;;  %s42_s10 = int_to_ptr.vmem [resolvable:$true] %s41_s10 }
  0x16   :  { %s631_s13 = scalar_lea.hbm %s875_s0, 128 }
  0x17   :  { %p632_p8 = scmp.ne.s32.totalorder %s875_s0, %s631_s13  ;;  %p635_p9 = scmp.lt.u32.totalorder %s631_s13, %s875_s0 }
  0x19   :  { %p637_p10 = pnand %p635_p9, %p632_p8 }
  0x1b   :  { %640 = shalt.err (!%p637_p10)
}
  0x1c   :  { %s641_s1 = scalar_lea.vmem %s21_s8, 128  ;;  %p646_p12 = scmp.lt.s32.totalorder %s21_s8, %s21_s8 }
  0x1d   :  { %p642_p11 = scmp.ne.s32.totalorder %s21_s8, %s641_s1  ;;  %p647_p13 = scmp.lt.s32.totalorder %s641_s1, %s641_s1 }
  0x1f   :  { %p648_p0 = por %p647_p13, %p646_p12 }
  0x21   :  { %p649_p1 = pnand %p648_p0, %p642_p11 }
  0x23   :  { %652 = shalt.err (!%p649_p1)
}
  0x24   :  { %23 = dma.hbm_to_vmem [thread:$0]  %s875_s0, 128, %s21_s8, [#allocation3]  }
  0x25   :  { %s653_s22 = scalar_lea.hbm %s877_s2, 2048 }
  0x26   :  { %p654_p2 = scmp.ne.s32.totalorder %s877_s2, %s653_s22  ;;  %p657_p3 = scmp.lt.u32.totalorder %s653_s22, %s877_s2 }
  0x28   :  { %p659_p4 = pnand %p657_p3, %p654_p2 }
  0x2a   :  { %662 = shalt.err (!%p659_p4)
}
  0x2b   :  { %s663_s27 = scalar_lea.vmem %s42_s10, 2048  ;;  %p668_p6 = scmp.lt.s32.totalorder %s42_s10, %s42_s10 }
  0x2c   :  { %p664_p5 = scmp.ne.s32.totalorder %s42_s10, %s663_s27  ;;  %p669_p7 = scmp.lt.s32.totalorder %s663_s27, %s663_s27 }
  0x2e   :  { %p670_p8 = por %p669_p7, %p668_p6 }
  0x30   :  { %p671_p9 = pnand %p670_p8, %p664_p5 }
  0x32   :  { %674 = shalt.err (!%p671_p9)
}
  0x33   :  { %47 = dma.hbm_to_vmem [thread:$0]  %s877_s2, 2048, %s42_s10, [#allocation6], %s728_s28, %s728_s28, %s729_s29  }
  0x34   :  { %s732_s6 = smov [#allocation8]   ;;  %s675_s11 = scalar_lea.hbm %s878_s3, 2048 }
  0x35   :  { %s53_s7 = sshll.u32 %s732_s6, 4  ;;  %p676_p10 = scmp.ne.s32.totalorder %s878_s3, %s675_s11  ;;  %s54_s7 = int_to_ptr.vmem [resolvable:$true] %s53_s7 }
  0x36   :  { %p679_p11 = scmp.lt.u32.totalorder %s675_s11, %s878_s3 }
  0x38   :  { %p681_p12 = pnand %p679_p11, %p676_p10 }
  0x3a   :  { %684 = shalt.err (!%p681_p12)
}
  0x3b   :  { %s685_s16 = scalar_lea.vmem %s54_s7, 2048  ;;  %p690_p0 = scmp.lt.s32.totalorder %s54_s7, %s54_s7 }
  0x3c   :  { %p686_p13 = scmp.ne.s32.totalorder %s54_s7, %s685_s16  ;;  %p691_p1 = scmp.lt.s32.totalorder %s685_s16, %s685_s16 }
  0x3e   :  { %p692_p2 = por %p691_p1, %p690_p0 }
  0x40   :  { %p693_p3 = pnand %p692_p2, %p686_p13 }
  0x42   :  { %696 = shalt.err (!%p693_p3)
}
  0x43   :  { %59 = dma.hbm_to_vmem [thread:$0]  %s878_s3, 2048, %s54_s7, [#allocation9], %s728_s28, %s728_s28, %s729_s29  }
  0x44   :  { %719 = dma.done.wait [#allocation3], 128  }
  0x45   :  { %720 = vsyncadd [#allocation3], 4294967168 }
  0x46   :  { %721 = dma.done.wait [#allocation6], 4096  }
  0x47   :  { %722 = vsyncadd [#allocation6], 4294963200 }
  0x48   :  { %723 = dma.done.wait [#allocation9], 2048  }
  0x49   :  { %724 = vsyncadd [#allocation9], 4294965248  ;;  %v733_v0 = vmov 0.0|0.0   ;;  %vm734_vm0 = vmmov 0   ;;  %v735_v1 = vmov 0.0   ;;  %v75_v2 = vld [vmem:[#allocation5] sm:$0xff] }
  0x4a   :  { %527 = vmatprep.subr.bf16.mxu0 %v733_v0  ;;  %454 = vmatprep.mubr.msk.f32.mxu0 %vm734_vm0, %v735_v1  ;;  %v76_v3 = vld [vmem:[#allocation5 + $0x8] sm:$0xff]  ;;  %v77_v4 = vld [vmem:[#allocation5 + $0x10] sm:$0xff]  ;;  %v78_v6 = vld [vmem:[#allocation5 + $0x18] sm:$0xff]  ;;  %s736_s19 = smov [#allocation10]  }
  0x4b   :  { %551 = vmatprep.subr.bf16.mxu1 %v733_v0  ;;  %489 = vmatprep.mubr.msk.f32.mxu1 %vm734_vm0, %v735_v1  ;;  %v528_v5 = vpack.c.bf16 %v76_v3, %v75_v2  ;;  %v531_v7 = vpack.c.bf16 %v78_v6, %v77_v4  ;;  %v79_v8 = vld [vmem:[#allocation5 + $0x20] sm:$0xff]  ;;  %v80_v9 = vld [vmem:[#allocation5 + $0x28] sm:$0xff]  ;;  %v169_v12 = vld [vmem:[#allocation7 + $0x10] sm:$0xff]  ;;  %s357_s20 = sshll.u32 %s736_s19, 4  ;;  %s358_s20 = int_to_ptr.vmem [resolvable:$true] %s357_s20 }
  0x4c   :  { %v167_v10 = vld [vmem:[#allocation7] sm:$0xff]  ;;  %v168_v11 = vld [vmem:[#allocation7 + $0x8] sm:$0xff]  ;;  %v170_v13 = vld [vmem:[#allocation7 + $0x18] sm:$0xff]  ;;  %v534_v14 = vpack.c.bf16 %v80_v9, %v79_v8  ;;  %s697_s21 = scalar_lea.vmem %s358_s20, 128  ;;  %p702_p5 = scmp.lt.s32.totalorder %s358_s20, %s358_s20 }
  0x4d   :  { %529 = vmatpush3.bf16.msra.mxu0 %v528_v5  ;;  %v552_v15 = vpack.c.bf16 %v168_v11, %v167_v10  ;;  %v81_v16 = vld [vmem:[#allocation5 + $0x30] sm:$0xff]  ;;  %v82_v17 = vld [vmem:[#allocation5 + $0x38] sm:$0xff]  ;;  %v555_v18 = vpack.c.bf16 %v170_v13, %v169_v12  ;;  %v171_v19 = vld [vmem:[#allocation7 + $0x20] sm:$0xff]  ;;  %p698_p4 = scmp.ne.s32.totalorder %s358_s20, %s697_s21  ;;  %p703_p6 = scmp.lt.s32.totalorder %s697_s21, %s697_s21 }
  0x4e   :  { %530 = vmatprep.subr.bf16.mxu0 %v733_v0  ;;  %v172_v20 = vld [vmem:[#allocation7 + $0x28] sm:$0xff]  ;;  %v537_v21 = vpack.c.bf16 %v82_v17, %v81_v16  ;;  %v83_v22 = vld [vmem:[#allocation5 + $0x40] sm:$0xff]  ;;  %v173_v25 = vld [vmem:[#allocation7 + $0x30] sm:$0xff] }
  0x4f   :  { %553 = vmatpush3.bf16.msra.mxu1 %v552_v15  ;;  %v84_v23 = vld [vmem:[#allocation5 + $0x48] sm:$0xff]  ;;  %v558_v24 = vpack.c.bf16 %v172_v20, %v171_v19  ;;  %v174_v26 = vld [vmem:[#allocation7 + $0x38] sm:$0xff]  ;;  %v85_v28 = vld [vmem:[#allocation5 + $0x50] sm:$0xff]  ;;  %p704_p7 = por %p703_p6, %p702_p5 }
  0x50   :  { %554 = vmatprep.subr.bf16.mxu1 %v733_v0  ;;  %v540_v27 = vpack.c.bf16 %v84_v23, %v83_v22  ;;  %v86_v29 = vld [vmem:[#allocation5 + $0x58] sm:$0xff]  ;;  %v561_v30 = vpack.c.bf16 %v174_v26, %v173_v25  ;;  %v175_v31 = vld [vmem:[#allocation7 + $0x40] sm:$0xff]  ;;  %v176_v32 = vld [vmem:[#allocation7 + $0x48] sm:$0xff] }
  0x51   :  { %532 = vmatpush3.bf16.msra.mxu0 %v531_v7  ;;  %v543_v33 = vpack.c.bf16 %v86_v29, %v85_v28  ;;  %v87_v34 = vld [vmem:[#allocation5 + $0x60] sm:$0xff]  ;;  %v88_v35 = vld [vmem:[#allocation5 + $0x68] sm:$0xff]  ;;  %v564_v36 = vpack.c.bf16 %v176_v32, %v175_v31  ;;  %v177_v37 = vld [vmem:[#allocation7 + $0x50] sm:$0xff]  ;;  %p705_p8 = pnand %p704_p7, %p698_p4 }
  0x52   :  { %533 = vmatprep.subr.bf16.mxu0 %v733_v0  ;;  %v178_v38 = vld [vmem:[#allocation7 + $0x58] sm:$0xff]  ;;  %v546_v39 = vpack.c.bf16 %v88_v35, %v87_v34  ;;  %v89_v40 = vld [vmem:[#allocation5 + $0x70] sm:$0xff]  ;;  %v179_v43 = vld [vmem:[#allocation7 + $0x60] sm:$0xff] }
  0x53   :  { %556 = vmatpush3.bf16.msra.mxu1 %v555_v18  ;;  %v90_v41 = vld [vmem:[#allocation5 + $0x78] sm:$0xff]  ;;  %v567_v42 = vpack.c.bf16 %v178_v38, %v177_v37  ;;  %v180_v44 = vld [vmem:[#allocation7 + $0x68] sm:$0xff]  ;;  %v181_v48 = vld [vmem:[#allocation7 + $0x70] sm:$0xff] }
  0x54   :  { %557 = vmatprep.subr.bf16.mxu1 %v733_v0  ;;  %v549_v45 = vpack.c.bf16 %v90_v41, %v89_v40  ;;  %v570_v46 = vpack.c.bf16 %v180_v44, %v179_v43  ;;  %v74_v47 = vld [vmem:[#allocation2] sm:$0xff]  ;;  %v259_v51 = vld [vmem:[#allocation8] sm:$0xff]  ;;  %v260_v52 = vld [vmem:[#allocation8 + $0x8] sm:$0xff] }
  0x55   :  { %535 = vmatpush3.bf16.msra.mxu0 %v534_v14  ;;  %v182_v49 = vld [vmem:[#allocation7 + $0x78] sm:$0xff]  ;;  %v261_v53 = vld [vmem:[#allocation8 + $0x10] sm:$0xff]  ;;  %v576_v54 = vpack.c.bf16 %v260_v52, %v259_v51  ;;  %v263_v57 = vld [vmem:[#allocation8 + $0x20] sm:$0xff] }
  0x56   :  { %536 = vmatprep.subr.bf16.mxu0 %v733_v0  ;;  %v573_v50 = vpack.c.bf16 %v182_v49, %v181_v48  ;;  %v262_v55 = vld [vmem:[#allocation8 + $0x18] sm:$0xff]  ;;  %v264_v58 = vld [vmem:[#allocation8 + $0x28] sm:$0xff]  ;;  %v265_v60 = vld [vmem:[#allocation8 + $0x30] sm:$0xff] }
  0x57   :  { %559 = vmatpush3.bf16.msra.mxu1 %v558_v24  ;;  %v579_v56 = vpack.c.bf16 %v262_v55, %v261_v53  ;;  %v582_v59 = vpack.c.bf16 %v264_v58, %v263_v57  ;;  %v266_v61 = vld [vmem:[#allocation8 + $0x38] sm:$0xff]  ;;  %v267_v63 = vld [vmem:[#allocation8 + $0x40] sm:$0xff]  ;;  %v269_v3 = vld [vmem:[#allocation8 + $0x50] sm:$0xff] }
  0x58   :  { %560 = vmatprep.subr.bf16.mxu1 %v733_v0  ;;  %v585_v62 = vpack.c.bf16 %v266_v61, %v265_v60  ;;  %v270_v4 = vld [vmem:[#allocation8 + $0x58] sm:$0xff]  ;;  %v271_v6 = vld [vmem:[#allocation8 + $0x60] sm:$0xff]  ;;  %v272_v7 = vld [vmem:[#allocation8 + $0x68] sm:$0xff] }
  0x59   :  { %538 = vmatpush3.bf16.msra.mxu0 %v537_v21  ;;  %v591_v5 = vpack.c.bf16 %v270_v4, %v269_v3  ;;  %v594_v8 = vpack.c.bf16 %v272_v7, %v271_v6  ;;  %v368_v9 = vld [vmem:[%s879_s4] ss:$0 sm:$0xff]  ;;  %v273_v14 = vld [vmem:[#allocation8 + $0x70] sm:$0xff]  ;;  %v369_v17 = vld [vmem:[%s879_s4 + $0x1] ss:$0 sm:$0xff] }
  0x5a   :  { %539 = vmatprep.subr.bf16.mxu0 %v733_v0  ;;  %v274_v15 = vld [vmem:[#allocation8 + $0x78] sm:$0xff] }
  0x5b   :  { %562 = vmatpush3.bf16.msra.mxu1 %v561_v30  ;;  %v597_v16 = vpack.c.bf16 %v274_v15, %v273_v14  ;;  %v370_v21 = vld [vmem:[%s879_s4 + $0x2] ss:$0 sm:$0xff] }
  0x5c   :  { %563 = vmatprep.subr.bf16.mxu1 %v733_v0 }
  0x5d   :  { %541 = vmatpush3.bf16.msra.mxu0 %v540_v27 }
  0x5e   :  { %542 = vmatprep.subr.bf16.mxu0 %v733_v0 }
  0x5f   :  { %565 = vmatpush3.bf16.msra.mxu1 %v564_v36 }
  0x60   :  { %566 = vmatprep.subr.bf16.mxu1 %v733_v0 }
  0x61   :  { %544 = vmatpush3.bf16.msra.mxu0 %v543_v33 }
  0x62   :  { %545 = vmatprep.subr.bf16.mxu0 %v733_v0 }
  0x63   :  { %568 = vmatpush3.bf16.msra.mxu1 %v567_v42 }
  0x64   :  { %569 = vmatprep.subr.bf16.mxu1 %v733_v0 }
  0x65   :  { %547 = vmatpush3.bf16.msra.mxu0 %v546_v39 }
  0x66   :  { %548 = vmatprep.subr.bf16.mxu0 %v733_v0 }
  0x67   :  { %571 = vmatpush3.bf16.msra.mxu1 %v570_v46 }
  0x68   :  { %572 = vmatprep.subr.bf16.mxu1 %v733_v0 }
  0x69   :  { %550 = vmatpush3.bf16.msra.mxu0 %v549_v45 }
  0x6a   :  { %575 = vmatprep.subr.bf16.mxu0 %v733_v0 }
  0x6b   :  { %574 = vmatpush3.bf16.msra.mxu1 %v573_v50 }
  0x6c   :  { %455 = vmatmul.mubr.f32.vlgmr.msra.gmra.mrb[0].mxu0 %v74_v47 }
  0x6d   :  { %524 = vmatprep.mubr.msk.f32.mxu0 %vm734_vm0, %v735_v1  ;;  %577 = vmatpush3.bf16.msra.mxu0 %v576_v54  ;;  %v268_v1 = vld [vmem:[#allocation8 + $0x48] sm:$0xff] }
  0x6e   :  { %578 = vmatprep.subr.bf16.mxu0 %v733_v0  ;;  %v588_v2 = vpack.c.bf16 %v268_v1, %v267_v63 }
  0x71   :  { %580 = vmatpush3.bf16.msra.mxu0 %v579_v56 }
  0x72   :  { %581 = vmatprep.subr.bf16.mxu0 %v733_v0 }
  0x75   :  { %583 = vmatpush3.bf16.msra.mxu0 %v582_v59 }
  0x76   :  { %584 = vmatprep.subr.bf16.mxu0 %v733_v0 }
  0x79   :  { %586 = vmatpush3.bf16.msra.mxu0 %v585_v62 }
  0x7a   :  { %587 = vmatprep.subr.bf16.mxu0 %v733_v0 }
  0x7d   :  { %589 = vmatpush3.bf16.msra.mxu0 %v588_v2 }
  0x7e   :  { %590 = vmatprep.subr.bf16.mxu0 %v733_v0 }
  0x81   :  { %592 = vmatpush3.bf16.msra.mxu0 %v591_v5 }
  0x82   :  { %593 = vmatprep.subr.bf16.mxu0 %v733_v0 }
  0x85   :  { %595 = vmatpush3.bf16.msra.mxu0 %v594_v8 }
  0x86   :  { %596 = vmatprep.subr.bf16.mxu0 %v733_v0 }
  0x89   :  { %598 = vmatpush3.bf16.msra.mxu0 %v597_v16 }
 0x13f   :  { %v162_v10 = vpop.f32.mrb[0].mxu0 }
 0x140   :  { %v163_v11 = vadd.f32 %v368_v9, %v162_v10  ;;  %v456_v12 = vpop.f32.mrb[1].mxu0 }
 0x142   :  { %v166_v13 = vmax.f32 %v163_v11, 0.0 }
 0x144   :  { %490 = vmatmul.mubr.f32.vlgmr.msra.gmra.mrb[0].mxu1 %v166_v13 }
 0x217   :  { %v254_v18 = vpop.f32.mrb[0].mxu1 }
 0x218   :  { %v255_v19 = vadd.f32 %v369_v17, %v254_v18  ;;  %v491_v0 = vpop.f32.mrb[1].mxu1 }
 0x21a   :  { %v258_v20 = vmax.f32 %v255_v19, 0.0 }
 0x21c   :  { %525 = vmatmul.mubr.f32.vlgmr.msra.gmra.mrb[2].mxu0 %v258_v20 }
 0x2ef   :  { %v346_v22 = vpop.f32.mrb[2].mxu0 }
 0x2f0   :  { %v347_v23 = vadd.f32 %v370_v21, %v346_v22  ;;  %v526_v24 = vpop.f32.mrb[3].mxu0 }
 0x2f2   :  { %350 = vst [vmem:[#allocation10] sm:$0xff] %v347_v23 }
 0x2f3   :  { %708 = shalt.err (!%p705_p8)
}
 0x2f4   :  { %s709_s24 = scalar_lea.hbm %s880_s5, 128 }
 0x2f5   :  { %p710_p9 = scmp.ne.s32.totalorder %s880_s5, %s709_s24  ;;  %p713_p10 = scmp.lt.u32.totalorder %s709_s24, %s880_s5 }
 0x2f7   :  { %p715_p11 = pnand %p713_p10, %p710_p9 }
 0x2f9   :  { %718 = shalt.err (!%p715_p11)
}
 0x2fa   :  { %360 = dma.vmem_to_hbm [thread:$0]  %s358_s20, 128, %s880_s5, [#allocation4]  }
 0x2fb   :  { %725 = dma.done.wait [#allocation4], 128  }
 0x2fc   :  { %726 = vsyncadd [#allocation4], 4294967168 }
 0x2fd   :  { %364 = vsyncpa [#allocation3], 1 }
 0x2fe   :  { %365 = vsyncpa [#allocation6], 1 }
 0x2ff   :  { %366 = vsyncpa [#allocation9], 1 }
 0x300   :  { %367 = vsyncpa [#allocation4], 1 }

</bundles_post_ra>
